<compile_context>
chip_gen: v7x
topology: tpu7x:2x2x1
jax: 0.10.0
libtpu: 0.0.40
codegen_flags: <defaults>
</compile_context>

<pallas_src>
import jax
import jax.numpy as jnp
import numpy as np
from jax.experimental import pallas as pl
from jax.experimental.pallas import tpu as pltpu


def _upsample1x1_kernel(x_ref, w_ref, b_ref, o_ref):
    # x_ref: (tb, C_in)          activations tile
    # w_ref: (C4p, C_in)         conv1x1 weight in native PyTorch (O, I) layout
    # b_ref: (1, C4p)            bias row
    # o_ref: (tb, C4p)           lane-dense output slab (C4p % 128 == 0)
    h = jnp.maximum(x_ref[...], 0.0)                     # pre-activation ReLU
    # h @ W^T without transposing W: contract C_in (dim 1) with C_in (dim 1).
    y = jax.lax.dot_general(
        h, w_ref[...],
        dimension_numbers=(((1,), (1,)), ((), ())),
        preferred_element_type=jnp.float32)              # default precision, f32 acc
    o_ref[...] = (y + b_ref[...].astype(jnp.float32)).astype(o_ref.dtype)


def _pick_tile_b(B):
    """Batch tile: single block for small B, <=512-row tiles otherwise."""
    if B <= 512:
        return B
    for tb in (512, 256, 128, 64, 32, 16, 8):
        if B % tb == 0:
            return tb
    return B  # awkward batch size: fall back to one block


def upsample1x1_pallas(x_nchw, w_oi, b, *, out_dtype=None):
    """Upsample1x1 forward.

    Args:
      x_nchw: (B, C_in, 1, 1) input (PyTorch NCHW, 1x1 spatial).
      w_oi:   (4*C_out, C_in) Conv2d 1x1 weight (kernel dims squeezed), (O, I).
      b:      (4*C_out,) bias.
      out_dtype: output dtype (default: input dtype).
    Returns:
      (B, C_out, 2, 2), matching the PyTorch module.
    """
    B, C_in = x_nchw.shape[0], x_nchw.shape[1]
    assert x_nchw.shape[2] == 1 and x_nchw.shape[3] == 1, "1x1 spatial expected"
    C4 = w_oi.shape[0]
    assert C4 % 4 == 0
    out_dtype = out_dtype or x_nchw.dtype

    # Pad the output-channel (lane) axis to a multiple of 128 for unmasked,
    # full-width stores.  Zero weight rows / zero bias make the padding inert.
    C4p = ((C4 + 127) // 128) * 128
    if C4p != C4:
        w_oi = jnp.pad(w_oi, ((0, C4p - C4), (0, 0)))
        b = jnp.pad(b, (0, C4p - C4))

    x2d = x_nchw.reshape(B, C_in)        # drop the 1x1 spatial dims (free)
    b2d = b.reshape(1, C4p)

    tb = _pick_tile_b(B)
    grid = (pl.cdiv(B, tb),)

    out2d = pl.pallas_call(
        _upsample1x1_kernel,
        out_shape=jax.ShapeDtypeStruct((B, C4p), out_dtype),
        grid=grid,
        in_specs=[
            pl.BlockSpec((tb, C_in), lambda i: (i, 0)),    # activations, tiled over B
            pl.BlockSpec((C4p, C_in), lambda i: (0, 0)),   # weight (O, I), grid-invariant
            pl.BlockSpec((1, C4p), lambda i: (0, 0)),      # bias row, grid-invariant
        ],
        out_specs=pl.BlockSpec((tb, C4p), lambda i: (i, 0)),
        compiler_params=pltpu.CompilerParams(
            dimension_semantics=("parallel",)),            # shards B across v7x TCs
    )(x2d, w_oi, b2d)

    if C4p != C4:
        out2d = out2d[:, :C4]

    # x.view(B, C//4, 2, 2): channel c -> (c // 4, (c % 4) // 2, c % 2); a plain
    # row-major reshape of the (B, 4*C_out) slab reproduces this exactly.
    return out2d.reshape(B, C4 // 4, 2, 2)


def upsample1x1_ref(x_nchw, w_oi, b):
    """Pure-JAX f32 reference (same math as the PyTorch module)."""
    B, C_in = x_nchw.shape[0], x_nchw.shape[1]
    C4 = w_oi.shape[0]
    h = jax.nn.relu(x_nchw.reshape(B, C_in).astype(jnp.float32))
    y = jnp.dot(h, w_oi.T.astype(jnp.float32),
                precision=jax.lax.Precision.HIGHEST) + b.astype(jnp.float32)
    return y.reshape(B, C4 // 4, 2, 2)


if __name__ == "__main__":
    key = jax.random.PRNGKey(0)
    B, C_in, C_out = 2, 4, 8
    k0, k1, k2 = jax.random.split(key, 3)

    # PyTorch-convention NCHW input with 1x1 spatial, deterministic params.
    x = jax.random.normal(k0, (B, C_in, 1, 1), jnp.float32)
    w = jax.random.normal(k1, (4 * C_out, C_in), jnp.float32) * 0.1  # Conv2d (O, I, 1, 1) squeezed
    b = jax.random.normal(k2, (4 * C_out,), jnp.float32) * 0.1

    out = jax.block_until_ready(upsample1x1_pallas(x, w, b))
    ref = upsample1x1_ref(x, w, b)

    # Kernel uses default MXU precision (single bf16 pass, f32 accumulation);
    # reference is full-f32 HIGHEST, so tolerance reflects that expected delta.
    np.testing.assert_allclose(np.asarray(out), np.asarray(ref),
                               atol=1e-2, rtol=1e-2)
    assert out.shape == (B, C_out, 2, 2)
    print("KERNEL_OK")
</pallas_src>

<mosaic_0001>
module attributes {stable_mosaic.version = 11 : i64} {
  func.func @_upsample1x1_kernel(%arg0: i32, %arg1: memref<2x4xf32, #tpu.memory_space<vmem>>, %arg2: memref<128x4xf32, #tpu.memory_space<vmem>>, %arg3: memref<1x128xf32, #tpu.memory_space<vmem>>, %arg4: memref<2x128xf32, #tpu.memory_space<vmem>>) attributes {dimension_semantics = [#tpu.dimension_semantics<parallel>], iteration_bounds = array<i64: 1>, scalar_prefetch = 0 : i64, scratch_operands = 0 : i64, tpu.core_type = #tpu.core_type<tc>, window_params = [{transform_indices = @transform_0, window_bounds = array<i64: 2, 4>}, {pipeline_mode = #tpu.pipeline_mode<synchronous>, transform_indices = @transform_1, window_bounds = array<i64: 128, 4>}, {pipeline_mode = #tpu.pipeline_mode<synchronous>, transform_indices = @transform_2, window_bounds = array<i64: 1, 128>}, {transform_indices = @transform_3, window_bounds = array<i64: 2, 128>}]} {
    %c0 = arith.constant 0 : index
    %c0_0 = arith.constant 0 : index
    %0 = vector.load %arg1[%c0, %c0_0] : memref<2x4xf32, #tpu.memory_space<vmem>>, vector<2x4xf32>
    %cst = arith.constant 0.000000e+00 : f32
    %1 = vector.broadcast %cst : f32 to vector<2x4xf32>
    %2 = arith.maximumf %0, %1 : vector<2x4xf32>
    %c0_1 = arith.constant 0 : index
    %c0_2 = arith.constant 0 : index
    %3 = vector.load %arg2[%c0_1, %c0_2] : memref<128x4xf32, #tpu.memory_space<vmem>>, vector<128x4xf32>
    %cst_3 = arith.constant dense<0.000000e+00> : vector<2x128xf32>
    %4 = tpu.matmul %2, %3, %cst_3 {dimension_numbers = #tpu.dot_dimension_numbers<[1], [1], [0], [0], [0, 0, 1, 0], [], []>} : vector<2x4xf32>, vector<128x4xf32>, vector<2x128xf32> -> vector<2x128xf32>
    %c0_4 = arith.constant 0 : index
    %c0_5 = arith.constant 0 : index
    %5 = vector.load %arg3[%c0_4, %c0_5] : memref<1x128xf32, #tpu.memory_space<vmem>>, vector<1x128xf32>
    %6 = vector.broadcast %5 : vector<1x128xf32> to vector<2x128xf32>
    %7 = arith.addf %4, %6 : vector<2x128xf32>
    %c0_6 = arith.constant 0 : index
    %c0_7 = arith.constant 0 : index
    %8 = vector.load %arg4[%c0_6, %c0_7] : memref<2x128xf32, #tpu.memory_space<vmem>>, vector<2x128xf32>
    tpu.vector_store %arg4[%c0_6, %c0_7], %7 {strides = array<i32>} : memref<2x128xf32, #tpu.memory_space<vmem>>, vector<2x128xf32>,
    return
  }
  func.func @transform_0(%arg0: i32) -> (i32, i32) {
    %c0_i32 = arith.constant 0 : i32
    %c0_i32_0 = arith.constant 0 : i32
    return %arg0, %c0_i32 : i32, i32
  }
  func.func @transform_1(%arg0: i32) -> (i32, i32) {
    %c0_i32 = arith.constant 0 : i32
    %c0_i32_0 = arith.constant 0 : i32
    %c0_i32_1 = arith.constant 0 : i32
    return %c0_i32, %c0_i32_0 : i32, i32
  }
  func.func @transform_2(%arg0: i32) -> (i32, i32) {
    %c0_i32 = arith.constant 0 : i32
    %c0_i32_0 = arith.constant 0 : i32
    %c0_i32_1 = arith.constant 0 : i32
    return %c0_i32, %c0_i32_0 : i32, i32
  }
  func.func @transform_3(%arg0: i32) -> (i32, i32) {
    %c0_i32 = arith.constant 0 : i32
    %c0_i32_0 = arith.constant 0 : i32
    return %arg0, %c0_i32 : i32, i32
  }
}

</mosaic_0001>

<bundles_post_ra>
// kernel: tpu_custom_call.1
= control target key start
LH: loop header
LB: loop body
LE: loop exit
PB: predicated region body
PF: predicated region fallthrough
CT: control target
= control target key end

     0   :  { %vm40_vm0 = vcmask 31744   ;;  %v307_v2 = vmov 0.0|0.0   ;;  %vm308_vm2 = vmmov 0   ;;  %v309_v5 = vmov 0.0   ;;  %s420_s0 = inlined_call_operand.vmem [shape: f32[2,4], index: 0, kind: input, shape index: {}]   ;;  %s421_s1 = inlined_call_operand.vmem [shape: f32[128,4], index: 1, kind: input, shape index: {}]   ;;  %s422_s2 = inlined_call_operand.vmem [shape: f32[1,128], index: 2, kind: input, shape index: {}]   ;;  %s423_s3 = inlined_call_operand.hbm [shape: f32[2,128], index: 3, kind: output, shape index: {}]  }
   0x1   :  { %v17_v0 = vld [vmem:[%s421_s1] sm:$0xff]  ;;  %v18_v1 = vld [vmem:[%s421_s1 + $0x8] sm:$0xff]  ;;  %247 = vmatprep.subr.bf16.mxu0 %v307_v2  ;;  %vm339_vm1 = vmpackc.low %vm40_vm0, %vm40_vm0  ;;  %244 = vmatprep.mubr.msk.f32.mxu0 %vm308_vm2, %v309_v5 }
   0x2   :  { %v248_v3 = vpack.c.bf16 %v18_v1, %v17_v0  ;;  %v19_v6 = vld [vmem:[%s421_s1 + $0x10] sm:$0xff]  ;;  %v20_v7 = vld [vmem:[%s421_s1 + $0x18] sm:$0xff] }
   0x4   :  { %250 = vmatpush3.bf16.xpose.msk.msra.mxu0 %vm339_vm1, %v248_v3 }
   0x5   :  { %251 = vmatprep.subr.bf16.mxu0 %v307_v2 }
   0x6   :  { %8 = vsyncpa [#allocation3], 0  ;;  %v252_v8 = vpack.c.bf16 %v20_v7, %v19_v6  ;;  %v21_v9 = vld [vmem:[%s421_s1 + $0x20] sm:$0xff]  ;;  %v22_v10 = vld [vmem:[%s421_s1 + $0x28] sm:$0xff]  ;;  %s310_s21 = smov [#allocation2]  }
   0x7   :  { %v256_v11 = vpack.c.bf16 %v22_v10, %v21_v9  ;;  %v23_v12 = vld [vmem:[%s421_s1 + $0x30] sm:$0xff]  ;;  %v24_v13 = vld [vmem:[%s421_s1 + $0x38] sm:$0xff]  ;;  %v25_v15 = vld [vmem:[%s421_s1 + $0x40] sm:$0xff]  ;;  %s169_s22 = sshll.u32 %s310_s21, 4  ;;  %s170_s22 = int_to_ptr.vmem [resolvable:$true] %s169_s22 }
   0x8   :  { %v260_v14 = vpack.c.bf16 %v24_v13, %v23_v12  ;;  %v26_v16 = vld [vmem:[%s421_s1 + $0x48] sm:$0xff]  ;;  %v27_v18 = vld [vmem:[%s421_s1 + $0x50] sm:$0xff]  ;;  %v28_v19 = vld [vmem:[%s421_s1 + $0x58] sm:$0xff]  ;;  %p288_p1 = scmp.lt.s32.totalorder %s170_s22, %s170_s22 }
   0x9   :  { %v264_v17 = vpack.c.bf16 %v26_v16, %v25_v15  ;;  %v268_v20 = vpack.c.bf16 %v28_v19, %v27_v18  ;;  %v29_v21 = vld [vmem:[%s421_s1 + $0x60] sm:$0xff]  ;;  %v30_v22 = vld [vmem:[%s421_s1 + $0x68] sm:$0xff]  ;;  %v31_v24 = vld [vmem:[%s421_s1 + $0x70] sm:$0xff] }
   0xa   :  { %v272_v23 = vpack.c.bf16 %v30_v22, %v29_v21  ;;  %v32_v25 = vld [vmem:[%s421_s1 + $0x78] sm:$0xff]  ;;  %v15_v27 = vld [vmem:[%s420_s0] sm:$0x3]  ;;  %s283_s1 = scalar_lea.vmem %s170_s22, 32 }
   0xb   :  { %v276_v26 = vpack.c.bf16 %v32_v25, %v31_v24  ;;  %v16_v28 = vmax.f32 %v15_v27, 0.0  ;;  %v177_v29 = vld [vmem:[%s422_s2] ss:$0 sm:$0xff]  ;;  %p284_p0 = scmp.ne.s32.totalorder %s170_s22, %s283_s1  ;;  %p289_p2 = scmp.lt.s32.totalorder %s283_s1, %s283_s1 }
   0xc   :  { %254 = vmatpush3.bf16.xpose.msk.msra.mxu0 %vm339_vm1, %v252_v8 }
   0xd   :  { %255 = vmatprep.subr.bf16.mxu0 %v307_v2  ;;  %p290_p3 = por %p289_p2, %p288_p1 }
   0xf   :  { %p291_p4 = pnand %p290_p3, %p284_p0 }
  0x14   :  { %258 = vmatpush3.bf16.xpose.msk.msra.mxu0 %vm339_vm1, %v256_v11 }
  0x15   :  { %259 = vmatprep.subr.bf16.mxu0 %v307_v2 }
  0x1c   :  { %262 = vmatpush3.bf16.xpose.msk.msra.mxu0 %vm339_vm1, %v260_v14 }
  0x1d   :  { %263 = vmatprep.subr.bf16.mxu0 %v307_v2 }
  0x24   :  { %266 = vmatpush3.bf16.xpose.msk.msra.mxu0 %vm339_vm1, %v264_v17 }
  0x25   :  { %267 = vmatprep.subr.bf16.mxu0 %v307_v2 }
  0x2c   :  { %270 = vmatpush3.bf16.xpose.msk.msra.mxu0 %vm339_vm1, %v268_v20 }
  0x2d   :  { %271 = vmatprep.subr.bf16.mxu0 %v307_v2 }
  0x34   :  { %274 = vmatpush3.bf16.xpose.msk.msra.mxu0 %vm339_vm1, %v272_v23 }
  0x35   :  { %275 = vmatprep.subr.bf16.mxu0 %v307_v2 }
  0x3c   :  { %278 = vmatpush3.bf16.xpose.msk.msra.mxu0 %vm339_vm1, %v276_v26 }
  0x43   :  { %245 = vmatmul.mubr.msk.f32.vlgmr.msra.gmra.mrb[0].mxu0 %vm40_vm0, %v16_v28 }
 0x116   :  { %v158_v30 = vpop.f32.mrb[0].mxu0 }
 0x117   :  { %v159_v31 = vadd.f32 %v177_v29, %v158_v30  ;;  %v246_v32 = vpop.f32.mrb[1].mxu0 }
 0x119   :  { %162 = vst [vmem:[#allocation2] sm:$0x3] %v159_v31 }
 0x11a   :  { %294 = shalt.err (!%p291_p4)
}
 0x11b   :  { %s295_s24 = scalar_lea.hbm %s423_s3, 32 }
 0x11c   :  { %p296_p5 = scmp.ne.s32.totalorder %s423_s3, %s295_s24  ;;  %p299_p6 = scmp.lt.u32.totalorder %s295_s24, %s423_s3 }
 0x11e   :  { %p301_p7 = pnand %p299_p6, %p296_p5 }
 0x120   :  { %304 = shalt.err (!%p301_p7)
}
 0x121   :  { %172 = dma.vmem_to_hbm [thread:$0]  %s170_s22, 32, %s423_s3, [#allocation3]  }
 0x122   :  { %305 = dma.done.wait [#allocation3], 32  }
 0x123   :  { %306 = vsyncadd [#allocation3], 4294967264 }
 0x124   :  { %176 = vsyncpa [#allocation3], 1 }

</bundles_post_ra>
